<compile_context>
chip_gen: v7x
topology: tpu7x:2x2x1
jax: 0.10.0
libtpu: 0.0.40
codegen_flags: <defaults>
</compile_context>

<pallas_src>
import functools

import jax
import jax.numpy as jnp
from jax import lax
from jax.experimental import pallas as pl
from jax.experimental.pallas import tpu as pltpu

HEAD_W = 8  # fused head width: [action0, action1, action2, value, raise, pad, pad, pad]


def _round_up(n, m):
    return ((n + m - 1) // m) * m


# ----------------------------------------------------------------------------
# Kernel
# ----------------------------------------------------------------------------
def policy_value_kernel(
    x_ref,                      # (TB, 20)   f32
    w1_ref, b1_ref,             # (20, 64)   cdtype, (1, 64)  f32
    w2_ref, b2_ref,             # (64, 128)  cdtype, (1, 128) f32
    w3_ref, b3_ref,             # (128, 128) cdtype, (1, 128) f32
    wh_ref, bh_ref,             # fused heads: (128, 8) cdtype, (1, 8) f32
    out_ref,                    # (TB, 8) f32
):
    cdt = w1_ref.dtype

    # fc1 -> relu  (cast x to the MXU compute dtype in-kernel; f32 accumulation)
    h = jnp.dot(x_ref[...].astype(cdt), w1_ref[...],
                preferred_element_type=jnp.float32) + b1_ref[...]
    h = jnp.maximum(h, 0.0).astype(cdt)          # bf16 inter-layer activation
    # fc2 -> relu
    h = jnp.dot(h, w2_ref[...], preferred_element_type=jnp.float32) + b2_ref[...]
    h = jnp.maximum(h, 0.0).astype(cdt)
    # fc3 -> relu
    h = jnp.dot(h, w3_ref[...], preferred_element_type=jnp.float32) + b3_ref[...]
    h = jnp.maximum(h, 0.0).astype(cdt)

    # Fused heads: one MXU op -> lane-dense (TB, 8) slab.
    heads = jnp.dot(h, wh_ref[...], preferred_element_type=jnp.float32) + bh_ref[...]

    col = lax.broadcasted_iota(jnp.int32, heads.shape, 1)
    is_action = col < 3

    # --- softmax over the 3 action columns (numerically stable) ---
    m = jnp.max(jnp.where(is_action, heads, -jnp.inf), axis=-1, keepdims=True)
    # e is zeroed on non-action columns so the MXU-computed denominator stays finite.
    e = jnp.where(is_action, jnp.exp(heads - m), 0.0)
    # Denominator: sum of the 3 action columns, broadcast to every lane via a single
    # MXU push against a constant (8,8) mask (ones in rows 0..2) — avoids an XLU
    # lane-reduce + re-broadcast on lane-sparse vregs.
    row = lax.broadcasted_iota(jnp.int32, (HEAD_W, HEAD_W), 0)
    sum_mask = (row < 3).astype(jnp.float32)
    denom = jnp.dot(e, sum_mask, preferred_element_type=jnp.float32)
    probs = e * pl.reciprocal(denom, approx=False)   # exact normalization

    # --- sigmoid for the raise column: single EUP tanh push ---
    sig = 0.5 * (jnp.tanh(0.5 * heads) + 1.0)

    # Per-column select. Padded columns 5..7 carry sigmoid(0)=0.5 of the zero-padded
    # head; they are sliced away in the wrapper, so no extra zeroing pass is spent.
    out_ref[...] = jnp.where(is_action, probs, jnp.where(col == 3, heads, sig))


# ----------------------------------------------------------------------------
# One-time parameter packing (NOT in the per-call path)
# ----------------------------------------------------------------------------
def pack_params(params, compute_dtype=jnp.bfloat16):
    """Fuse + pad the three heads and cast weights/biases once, at init/load time."""
    (w1, b1, w2, b2, w3, b3, wa, ba, wv, bv, wr, br) = params
    wh = jnp.pad(jnp.concatenate([wa, wv, wr], axis=1), ((0, 0), (0, HEAD_W - 5)))
    bh = jnp.pad(jnp.concatenate([ba, bv, br], axis=1), ((0, 0), (0, HEAD_W - 5)))
    cd = compute_dtype
    packed = (
        w1.astype(cd), b1.astype(jnp.float32),
        w2.astype(cd), b2.astype(jnp.float32),
        w3.astype(cd), b3.astype(jnp.float32),
        wh.astype(cd), bh.astype(jnp.float32),
    )
    return jax.tree_util.tree_map(jnp.asarray, packed)


# ----------------------------------------------------------------------------
# Forward wrapper
# ----------------------------------------------------------------------------
@functools.partial(jax.jit, static_argnames=("batch_tile",))
def policy_value_forward(x, packed_params, *, batch_tile=None):
    """x: (B, 20) float32; packed_params from pack_params().

    Returns (action_probs (B, 3), state_values (B, 1), raise_amount (B, 1)).
    """
    (w1c, b1f, w2c, b2f, w3c, b3f, whc, bhf) = packed_params
    B, d_in = x.shape

    # Batch-tile selection:
    #  * derive TB from a balanced tile count (TB_MAX cap) so padding waste is <= 15
    #    rows per tile,
    #  * keep at least 2 tiles whenever the batch is big enough to split, so the
    #    "parallel" batch axis can be sharded across both v7x TensorCores,
    #  * multiple of 16 rows (sublane packing for bf16 intermediates).
    if batch_tile is None:
        TB_MAX = 1024
        min_tiles = 2 if B >= 32 else 1
        n_tiles = max(pl.cdiv(B, TB_MAX), min_tiles)
        TB = _round_up(pl.cdiv(B, n_tiles), 16)
    else:
        TB = _round_up(max(int(batch_tile), 1), 16)
    n_tiles = pl.cdiv(max(B, 1), TB)
    B_pad = n_tiles * TB

    x_p = x if B_pad == B else jnp.pad(x, ((0, B_pad - B), (0, 0)))

    def row_spec(width):
        return pl.BlockSpec((TB, width), lambda i: (i, 0))

    def resident(arr):
        # Full-array block with a constant index_map -> stays VMEM-resident across
        # all batch tiles (never re-fetched).
        return pl.BlockSpec(arr.shape, lambda i: (0, 0))

    out = pl.pallas_call(
        policy_value_kernel,
        out_shape=jax.ShapeDtypeStruct((B_pad, HEAD_W), jnp.float32),
        grid=(n_tiles,),
        in_specs=[
            row_spec(d_in),
            resident(w1c), resident(b1f),
            resident(w2c), resident(b2f),
            resident(w3c), resident(b3f),
            resident(whc), resident(bhf),
        ],
        out_specs=row_spec(HEAD_W),
        compiler_params=pltpu.CompilerParams(
            dimension_semantics=("parallel",),
            vmem_limit_bytes=32 * 1024 * 1024,
        ),
    )(x_p, w1c, b1f, w2c, b2f, w3c, b3f, whc, bhf)

    action_probs = out[:B, 0:3]
    state_values = out[:B, 3:4]
    raise_amount = out[:B, 4:5]
    return action_probs, state_values, raise_amount


# ----------------------------------------------------------------------------
# Deterministic parameter init (mirrors shapes/init of the nn.Module)
# ----------------------------------------------------------------------------
def init_params(key):
    def linear_init(key, fan_in, fan_out):
        kw, kb = jax.random.split(key)
        bound = 1.0 / jnp.sqrt(float(fan_in))
        w = jax.random.uniform(kw, (fan_in, fan_out), jnp.float32, -bound, bound)
        b = jax.random.uniform(kb, (1, fan_out), jnp.float32, -bound, bound)
        return w, b

    keys = jax.random.split(key, 6)
    w1, b1 = linear_init(keys[0], 20, 64)
    w2, b2 = linear_init(keys[1], 64, 128)
    w3, b3 = linear_init(keys[2], 128, 128)
    # action_head weights/bias are explicitly zero-filled in the module.
    wa = jnp.zeros((128, 3), jnp.float32)
    ba = jnp.zeros((1, 3), jnp.float32)
    wv, bv = linear_init(keys[4], 128, 1)
    wr, br = linear_init(keys[5], 128, 1)
    return (w1, b1, w2, b2, w3, b3, wa, ba, wv, bv, wr, br)


# ----------------------------------------------------------------------------
# Pure-JAX reference (same bf16-input / f32-accumulate recipe as the kernel)
# ----------------------------------------------------------------------------
def reference_forward(x, params, compute_dtype=jnp.bfloat16):
    (w1, b1, w2, b2, w3, b3, wa, ba, wv, bv, wr, br) = params

    def dot(a, w):
        return jnp.dot(a.astype(compute_dtype), w.astype(compute_dtype),
                       preferred_element_type=jnp.float32)

    h = jax.nn.relu(dot(x, w1) + b1)
    h = jax.nn.relu(dot(h, w2) + b2)
    h = jax.nn.relu(dot(h, w3) + b3)
    action = jax.nn.softmax(dot(h, wa) + ba, axis=-1)
    value = dot(h, wv) + bv
    raise_amt = jax.nn.sigmoid(dot(h, wr) + br)
    return action, value, raise_amt


if __name__ == "__main__":
    key = jax.random.PRNGKey(0)
    kx, kp, kx2, kx3 = jax.random.split(key, 4)
    params = init_params(kp)
    packed = pack_params(params)           # one-time packing, outside per-call path

    # --- small shape consistent with the module (single tile) ---
    B = 2
    x = jax.random.normal(kx, (B, 20), jnp.float32)
    action_probs, state_values, raise_amount = policy_value_forward(x, packed)
    jax.block_until_ready((action_probs, state_values, raise_amount))

    ref_a, ref_v, ref_r = reference_forward(x, params)
    assert action_probs.shape == (B, 3)
    assert state_values.shape == (B, 1)
    assert raise_amount.shape == (B, 1)
    assert jnp.allclose(action_probs, ref_a, atol=2e-3)
    assert jnp.allclose(state_values, ref_v, atol=2e-3)
    assert jnp.allclose(raise_amount, ref_r, atol=2e-3)
    # action head is zero-initialized -> uniform softmax, exactly normalized
    assert jnp.allclose(action_probs, 1.0 / 3.0, atol=2e-3)
    assert jnp.allclose(jnp.sum(action_probs, axis=-1), 1.0, atol=1e-3)

    # --- multi-tile path with explicit small tile (exercises padding, 7 tiles) ---
    B2 = 100
    x2 = jax.random.normal(kx2, (B2, 20), jnp.float32)
    a2, v2, r2 = policy_value_forward(x2, packed, batch_tile=16)
    jax.block_until_ready((a2, v2, r2))
    ra2, rv2, rr2 = reference_forward(x2, params)
    assert a2.shape == (B2, 3) and v2.shape == (B2, 1) and r2.shape == (B2, 1)
    assert jnp.allclose(a2, ra2, atol=2e-3)
    assert jnp.allclose(v2, rv2, atol=2e-3)
    assert jnp.allclose(r2, rr2, atol=2e-3)

    # --- default auto-tile path: balanced >=2 tiles (B=600 -> TB=304, 2 tiles) ---
    B3 = 600
    x3 = jax.random.normal(kx3, (B3, 20), jnp.float32)
    a3, v3, r3 = policy_value_forward(x3, packed)
    jax.block_until_ready((a3, v3, r3))
    ra3, rv3, rr3 = reference_forward(x3, params)
    assert a3.shape == (B3, 3) and v3.shape == (B3, 1) and r3.shape == (B3, 1)
    assert jnp.allclose(a3, ra3, atol=2e-3)
    assert jnp.allclose(v3, rv3, atol=2e-3)
    assert jnp.allclose(r3, rr3, atol=2e-3)
    assert jnp.allclose(jnp.sum(a3, axis=-1), 1.0, atol=1e-3)

    print("KERNEL_OK")
</pallas_src>

<mosaic_0001>
module attributes {stable_mosaic.version = 11 : i64} {
  func.func @policy_value_kernel(%arg0: i32, %arg1: memref<16x20xf32, #tpu.memory_space<vmem>>, %arg2: memref<20x64xbf16, #tpu.memory_space<vmem>>, %arg3: memref<1x64xf32, #tpu.memory_space<vmem>>, %arg4: memref<64x128xbf16, #tpu.memory_space<vmem>>, %arg5: memref<1x128xf32, #tpu.memory_space<vmem>>, %arg6: memref<128x128xbf16, #tpu.memory_space<vmem>>, %arg7: memref<1x128xf32, #tpu.memory_space<vmem>>, %arg8: memref<128x8xbf16, #tpu.memory_space<vmem>>, %arg9: memref<1x8xf32, #tpu.memory_space<vmem>>, %arg10: memref<16x8xf32, #tpu.memory_space<vmem>>) attributes {dimension_semantics = [#tpu.dimension_semantics<parallel>], iteration_bounds = array<i64: 1>, scalar_prefetch = 0 : i64, scratch_operands = 0 : i64, tpu.core_type = #tpu.core_type<tc>, window_params = [{transform_indices = @transform_0, window_bounds = array<i64: 16, 20>}, {pipeline_mode = #tpu.pipeline_mode<synchronous>, transform_indices = @transform_1, window_bounds = array<i64: 20, 64>}, {pipeline_mode = #tpu.pipeline_mode<synchronous>, transform_indices = @transform_2, window_bounds = array<i64: 1, 64>}, {pipeline_mode = #tpu.pipeline_mode<synchronous>, transform_indices = @transform_3, window_bounds = array<i64: 64, 128>}, {pipeline_mode = #tpu.pipeline_mode<synchronous>, transform_indices = @transform_4, window_bounds = array<i64: 1, 128>}, {pipeline_mode = #tpu.pipeline_mode<synchronous>, transform_indices = @transform_5, window_bounds = array<i64: 128, 128>}, {pipeline_mode = #tpu.pipeline_mode<synchronous>, transform_indices = @transform_6, window_bounds = array<i64: 1, 128>}, {pipeline_mode = #tpu.pipeline_mode<synchronous>, transform_indices = @transform_7, window_bounds = array<i64: 128, 8>}, {pipeline_mode = #tpu.pipeline_mode<synchronous>, transform_indices = @transform_8, window_bounds = array<i64: 1, 8>}, {transform_indices = @transform_9, window_bounds = array<i64: 16, 8>}]} {
    %c0 = arith.constant 0 : index
    %c0_0 = arith.constant 0 : index
    %0 = vector.load %arg1[%c0, %c0_0] : memref<16x20xf32, #tpu.memory_space<vmem>>, vector<16x20xf32>
    %1 = arith.truncf %0 : vector<16x20xf32> to vector<16x20xbf16>
    %c0_1 = arith.constant 0 : index
    %c0_2 = arith.constant 0 : index
    %2 = vector.load %arg2[%c0_1, %c0_2] : memref<20x64xbf16, #tpu.memory_space<vmem>>, vector<20x64xbf16>
    %cst = arith.constant dense<0.000000e+00> : vector<16x64xf32>
    %3 = tpu.matmul %1, %2, %cst {dimension_numbers = #tpu.dot_dimension_numbers<[1], [0], [0], [1], [0, 0, 1, 1], [], []>} : vector<16x20xbf16>, vector<20x64xbf16>, vector<16x64xf32> -> vector<16x64xf32>
    %c0_3 = arith.constant 0 : index
    %c0_4 = arith.constant 0 : index
    %4 = vector.load %arg3[%c0_3, %c0_4] : memref<1x64xf32, #tpu.memory_space<vmem>>, vector<1x64xf32>
    %5 = vector.broadcast %4 : vector<1x64xf32> to vector<16x64xf32>
    %6 = arith.addf %3, %5 : vector<16x64xf32>
    %cst_5 = arith.constant 0.000000e+00 : f32
    %7 = vector.broadcast %cst_5 : f32 to vector<16x64xf32>
    %8 = arith.maximumf %6, %7 : vector<16x64xf32>
    %9 = arith.truncf %8 : vector<16x64xf32> to vector<16x64xbf16>
    %c0_6 = arith.constant 0 : index
    %c0_7 = arith.constant 0 : index
    %10 = vector.load %arg4[%c0_6, %c0_7] : memref<64x128xbf16, #tpu.memory_space<vmem>>, vector<64x128xbf16>
    %cst_8 = arith.constant dense<0.000000e+00> : vector<16x128xf32>
    %11 = tpu.matmul %9, %10, %cst_8 {dimension_numbers = #tpu.dot_dimension_numbers<[1], [0], [0], [1], [0, 0, 1, 1], [], []>} : vector<16x64xbf16>, vector<64x128xbf16>, vector<16x128xf32> -> vector<16x128xf32>
    %c0_9 = arith.constant 0 : index
    %c0_10 = arith.constant 0 : index
    %12 = vector.load %arg5[%c0_9, %c0_10] : memref<1x128xf32, #tpu.memory_space<vmem>>, vector<1x128xf32>
    %13 = vector.broadcast %12 : vector<1x128xf32> to vector<16x128xf32>
    %14 = arith.addf %11, %13 : vector<16x128xf32>
    %cst_11 = arith.constant 0.000000e+00 : f32
    %15 = vector.broadcast %cst_11 : f32 to vector<16x128xf32>
    %16 = arith.maximumf %14, %15 : vector<16x128xf32>
    %17 = arith.truncf %16 : vector<16x128xf32> to vector<16x128xbf16>
    %c0_12 = arith.constant 0 : index
    %c0_13 = arith.constant 0 : index
    %18 = vector.load %arg6[%c0_12, %c0_13] : memref<128x128xbf16, #tpu.memory_space<vmem>>, vector<128x128xbf16>
    %cst_14 = arith.constant dense<0.000000e+00> : vector<16x128xf32>
    %19 = tpu.matmul %17, %18, %cst_14 {dimension_numbers = #tpu.dot_dimension_numbers<[1], [0], [0], [1], [0, 0, 1, 1], [], []>} : vector<16x128xbf16>, vector<128x128xbf16>, vector<16x128xf32> -> vector<16x128xf32>
    %c0_15 = arith.constant 0 : index
    %c0_16 = arith.constant 0 : index
    %20 = vector.load %arg7[%c0_15, %c0_16] : memref<1x128xf32, #tpu.memory_space<vmem>>, vector<1x128xf32>
    %21 = vector.broadcast %20 : vector<1x128xf32> to vector<16x128xf32>
    %22 = arith.addf %19, %21 : vector<16x128xf32>
    %cst_17 = arith.constant 0.000000e+00 : f32
    %23 = vector.broadcast %cst_17 : f32 to vector<16x128xf32>
    %24 = arith.maximumf %22, %23 : vector<16x128xf32>
    %25 = arith.truncf %24 : vector<16x128xf32> to vector<16x128xbf16>
    %c0_18 = arith.constant 0 : index
    %c0_19 = arith.constant 0 : index
    %26 = vector.load %arg8[%c0_18, %c0_19] : memref<128x8xbf16, #tpu.memory_space<vmem>>, vector<128x8xbf16>
    %cst_20 = arith.constant dense<0.000000e+00> : vector<16x8xf32>
    %27 = tpu.matmul %25, %26, %cst_20 {dimension_numbers = #tpu.dot_dimension_numbers<[1], [0], [0], [1], [0, 0, 1, 1], [], []>} : vector<16x128xbf16>, vector<128x8xbf16>, vector<16x8xf32> -> vector<16x8xf32>
    %c0_21 = arith.constant 0 : index
    %c0_22 = arith.constant 0 : index
    %28 = vector.load %arg9[%c0_21, %c0_22] : memref<1x8xf32, #tpu.memory_space<vmem>>, vector<1x8xf32>
    %29 = vector.broadcast %28 : vector<1x8xf32> to vector<16x8xf32>
    %30 = arith.addf %27, %29 : vector<16x8xf32>
    %31 = tpu.iota {dimensions = array<i32: 1>} : vector<16x8xi32>
    %c3_i32 = arith.constant 3 : i32
    %32 = vector.broadcast %c3_i32 : i32 to vector<16x8xi32>
    %33 = arith.cmpi slt, %31, %32 : vector<16x8xi32>
    %cst_23 = arith.constant 0xFF800000 : f32
    %34 = vector.broadcast %cst_23 : f32 to vector<16x8xf32>
    %35 = arith.select %33, %30, %34 : vector<16x8xi1>, vector<16x8xf32>
    %cst_24 = arith.constant dense<0xFF800000> : vector<16xf32>
    %36 = vector.multi_reduction <maximumf>, %35, %cst_24 [1] : vector<16x8xf32> to vector<16xf32>
    %37 = vector.shape_cast %36 : vector<16xf32> to vector<16x1xf32>
    %38 = vector.broadcast %37 : vector<16x1xf32> to vector<16x8xf32>
    %39 = arith.subf %30, %38 : vector<16x8xf32>
    %40 = math.exp %39 : vector<16x8xf32>
    %cst_25 = arith.constant 0.000000e+00 : f32
    %41 = vector.broadcast %cst_25 : f32 to vector<16x8xf32>
    %42 = arith.select %33, %40, %41 : vector<16x8xi1>, vector<16x8xf32>
    %43 = tpu.iota {dimensions = array<i32: 0>} : vector<8x8xi32>
    %c3_i32_26 = arith.constant 3 : i32
    %44 = vector.broadcast %c3_i32_26 : i32 to vector<8x8xi32>
    %45 = arith.cmpi slt, %43, %44 : vector<8x8xi32>
    %46 = arith.extui %45 : vector<8x8xi1> to vector<8x8xi32>
    %47 = arith.sitofp %46 : vector<8x8xi32> to vector<8x8xf32>
    %cst_27 = arith.constant dense<0.000000e+00> : vector<16x8xf32>
    %48 = tpu.matmul %42, %47, %cst_27 {dimension_numbers = #tpu.dot_dimension_numbers<[1], [0], [0], [1], [0, 0, 1, 1], [], []>} : vector<16x8xf32>, vector<8x8xf32>, vector<16x8xf32> -> vector<16x8xf32>
    %49 = tpu.reciprocal %48 : vector<16x8xf32> -> vector<16x8xf32>
    %50 = arith.mulf %42, %49 : vector<16x8xf32>
    %cst_28 = arith.constant 5.000000e-01 : f32
    %51 = vector.broadcast %cst_28 : f32 to vector<16x8xf32>
    %52 = arith.mulf %51, %30 : vector<16x8xf32>
    %53 = math.tanh %52 : vector<16x8xf32>
    %cst_29 = arith.constant 1.000000e+00 : f32
    %54 = vector.broadcast %cst_29 : f32 to vector<16x8xf32>
    %55 = arith.addf %53, %54 : vector<16x8xf32>
    %cst_30 = arith.constant 5.000000e-01 : f32
    %56 = vector.broadcast %cst_30 : f32 to vector<16x8xf32>
    %57 = arith.mulf %56, %55 : vector<16x8xf32>
    %c3_i32_31 = arith.constant 3 : i32
    %58 = vector.broadcast %c3_i32_31 : i32 to vector<16x8xi32>
    %59 = arith.cmpi eq, %31, %58 : vector<16x8xi32>
    %60 = arith.select %59, %30, %57 : vector<16x8xi1>, vector<16x8xf32>
    %61 = arith.select %33, %50, %60 : vector<16x8xi1>, vector<16x8xf32>
    %c0_32 = arith.constant 0 : index
    %c0_33 = arith.constant 0 : index
    %62 = vector.load %arg10[%c0_32, %c0_33] : memref<16x8xf32, #tpu.memory_space<vmem>>, vector<16x8xf32>
    tpu.vector_store %arg10[%c0_32, %c0_33], %61 {strides = array<i32>} : memref<16x8xf32, #tpu.memory_space<vmem>>, vector<16x8xf32>,
    return
  }
  func.func @transform_0(%arg0: i32) -> (i32, i32) {
    %c0_i32 = arith.constant 0 : i32
    %c0_i32_0 = arith.constant 0 : i32
    return %arg0, %c0_i32 : i32, i32
  }
  func.func @transform_1(%arg0: i32) -> (i32, i32) {
    %c0_i32 = arith.constant 0 : i32
    %c0_i32_0 = arith.constant 0 : i32
    %c0_i32_1 = arith.constant 0 : i32
    return %c0_i32, %c0_i32_0 : i32, i32
  }
  func.func @transform_2(%arg0: i32) -> (i32, i32) {
    %c0_i32 = arith.constant 0 : i32
    %c0_i32_0 = arith.constant 0 : i32
    %c0_i32_1 = arith.constant 0 : i32
    return %c0_i32, %c0_i32_0 : i32, i32
  }
  func.func @transform_3(%arg0: i32) -> (i32, i32) {
    %c0_i32 = arith.constant 0 : i32
    %c0_i32_0 = arith.constant 0 : i32
    %c0_i32_1 = arith.constant 0 : i32
    return %c0_i32, %c0_i32_0 : i32, i32
  }
  func.func @transform_4(%arg0: i32) -> (i32, i32) {
    %c0_i32 = arith.constant 0 : i32
    %c0_i32_0 = arith.constant 0 : i32
    %c0_i32_1 = arith.constant 0 : i32
    return %c0_i32, %c0_i32_0 : i32, i32
  }
  func.func @transform_5(%arg0: i32) -> (i32, i32) {
    %c0_i32 = arith.constant 0 : i32
    %c0_i32_0 = arith.constant 0 : i32
    %c0_i32_1 = arith.constant 0 : i32
    return %c0_i32, %c0_i32_0 : i32, i32
  }
  func.func @transform_6(%arg0: i32) -> (i32, i32) {
    %c0_i32 = arith.constant 0 : i32
    %c0_i32_0 = arith.constant 0 : i32
    %c0_i32_1 = arith.constant 0 : i32
    return %c0_i32, %c0_i32_0 : i32, i32
  }
  func.func @transform_7(%arg0: i32) -> (i32, i32) {
    %c0_i32 = arith.constant 0 : i32
    %c0_i32_0 = arith.constant 0 : i32
    %c0_i32_1 = arith.constant 0 : i32
    return %c0_i32, %c0_i32_0 : i32, i32
  }
  func.func @transform_8(%arg0: i32) -> (i32, i32) {
    %c0_i32 = arith.constant 0 : i32
    %c0_i32_0 = arith.constant 0 : i32
    %c0_i32_1 = arith.constant 0 : i32
    return %c0_i32, %c0_i32_0 : i32, i32
  }
  func.func @transform_9(%arg0: i32) -> (i32, i32) {
    %c0_i32 = arith.constant 0 : i32
    %c0_i32_0 = arith.constant 0 : i32
    return %arg0, %c0_i32 : i32, i32
  }
}

</mosaic_0001>

<bundles_post_ra>
// kernel: policy_value_forward.1
= control target key start
LH: loop header
LB: loop body
LE: loop exit
PB: predicated region body
PF: predicated region fallthrough
CT: control target
= control target key end

     0   :  { %14 = vsyncpa [#allocation3], 0  ;;  %s755_s30 = smov [#allocation2]   ;;  %s949_s0 = inlined_call_operand.vmem [shape: f32[16,20], index: 0, kind: input, shape index: {}]   ;;  %s950_s1 = inlined_call_operand.hbm [shape: bf16[20,64], index: 1, kind: input, shape index: {}]   ;;  %s951_s2 = inlined_call_operand.vmem [shape: f32[1,64], index: 2, kind: input, shape index: {}]   ;;  %s952_s3 = inlined_call_operand.vmem [shape: bf16[64,128], index: 3, kind: input, shape index: {}]   ;;  %s953_s4 = inlined_call_operand.vmem [shape: f32[1,128], index: 4, kind: input, shape index: {}]   ;;  %s954_s5 = inlined_call_operand.vmem [shape: bf16[128,128], index: 5, kind: input, shape index: {}]   ;;  %s955_s6 = inlined_call_operand.vmem [shape: f32[1,128], index: 6, kind: input, shape index: {}]   ;;  %s956_s7 = inlined_call_operand.vmem [shape: bf16[128,8], index: 7, kind: input, shape index: {}]   ;;  %s957_s8 = inlined_call_operand.vmem [shape: f32[1,8], index: 8, kind: input, shape index: {}]   ;;  %s958_s9 = inlined_call_operand.vmem [shape: f32[16,8], index: 9, kind: output, shape index: {}]  }
   0x1   :  { %s22_s10 = sshll.u32 %s755_s30, 4  ;;  %s731_s13 = scalar_lea.hbm %s950_s1, 192  ;;  %s23_s10 = int_to_ptr.vmem [resolvable:$true] %s22_s10 }
   0x2   :  { %p732_p0 = scmp.ne.s32.totalorder %s950_s1, %s731_s13  ;;  %p735_p1 = scmp.lt.u32.totalorder %s731_s13, %s950_s1 }
   0x4   :  { %p737_p2 = pnand %p735_p1, %p732_p0 }
   0x6   :  { %740 = shalt.err (!%p737_p2)
}
   0x7   :  { %s741_s18 = scalar_lea.vmem %s23_s10, 192  ;;  %p746_p4 = scmp.lt.s32.totalorder %s23_s10, %s23_s10 }
   0x8   :  { %p742_p3 = scmp.ne.s32.totalorder %s23_s10, %s741_s18  ;;  %p747_p5 = scmp.lt.s32.totalorder %s741_s18, %s741_s18 }
   0xa   :  { %p748_p6 = por %p747_p5, %p746_p4 }
   0xc   :  { %p749_p7 = pnand %p748_p6, %p742_p3 }
   0xe   :  { %752 = shalt.err (!%p749_p7)
}
   0xf   :  { %s756_s19 = smov 64   ;;  %s757_s20 = smov 4  }
  0x10   :  { %28 = dma.hbm_to_vmem [thread:$0]  %s950_s1, 192, %s23_s10, [#allocation3], %s756_s19, %s756_s19, %s757_s20  }
  0x11   :  { %753 = dma.done.wait [#allocation3], 192  }
  0x12   :  { %754 = vsyncadd [#allocation3], 4294967104  ;;  %v758_v0 = vmov 0.0   ;;  %vm759_vm0 = vmmov 0   ;;  %v697_v1 = vld [vmem:[#allocation2] sm:$0xff]   ;;  %vm73_vm1 = vcmask 1041408   ;;  %v435_v57 = vlaneseq }
  0x13   :  { %626 = vmatprep.subr.bf16.mxu0 %v758_v0  ;;  %630 = vmatprep.mubr.msk.bf16.mxu0 %vm759_vm0, %v758_v0  ;;  %v698_v2 = vld [vmem:[#allocation2 + $0x8] ss:$0 sps:$4 sm:$0x33]   ;;  %v47_v3 = vld [vmem:[%s949_s0] sm:$0xff]  ;;  %vm69_vm2 = vcmask 162816   ;;  %v701_v9 = vld [vmem:[%s952_s3 + $0x10] sm:$0xff]  }
  0x14   :  { %634 = vmatprep.subr.bf16.mxu1 %v758_v0  ;;  %642 = vmatprep.mubr.msk.bf16.mxu1 %vm759_vm0, %v758_v0  ;;  %v48_v4 = vld [vmem:[%s949_s0 + $0x8] sm:$0xff]  ;;  %v75_v5 = vsel %vm73_vm1, %v698_v2, 0  ;;  %v699_v6 = vld [vmem:[%s952_s3] sm:$0xff]   ;;  %v702_v10 = vld [vmem:[%s952_s3 + $0x18] sm:$0xff]   ;;  %vm160_vm3 = vcmask 523264   ;;  %v436_v58 = vand.u32 127, %v435_v57 }
  0x15   :  { %627 = vmatpush3.bf16.msra.mxu0 %v697_v1  ;;  %v700_v7 = vld [vmem:[%s952_s3 + $0x8] sm:$0xff]   ;;  %v49_v8 = vpack.c.bf16 %v48_v4, %v47_v3  ;;  %635 = vmatpush3.bf16.msra.mxu1 %v699_v6  ;;  %v703_v11 = vld [vmem:[%s954_s5] sm:$0xff]   ;;  %v705_v13 = vld [vmem:[%s954_s5 + $0x10] sm:$0xff]   ;;  %vm440_vm5 = vcmask 64512   ;;  %v456_v6 = vshrl.u32 %v435_v57, 7 }
  0x16   :  { %628 = vmatprep.subr.bf16.mxu0 %v758_v0  ;;  %636 = vmatprep.subr.bf16.mxu1 %v758_v0  ;;  %v704_v12 = vld [vmem:[%s954_s5 + $0x8] sm:$0xff]   ;;  %v706_v14 = vld [vmem:[%s954_s5 + $0x18] sm:$0xff]   ;;  %v707_v15 = vld [vmem:[%s954_s5 + $0x20] sm:$0xff]   ;;  %vm437_vm4 = vcmp.lt.s32.totalorder %v436_v58, 3  ;;  %vm553_vm7 = vcmp.eq.s32.totalorder %v436_v58, 3 }
  0x17   :  { %v708_v16 = vld [vmem:[%s954_s5 + $0x28] sm:$0xff]   ;;  %v565_v17 = vld [vmem:[%s951_s2] ss:$0 sm:$0xff]  ;;  %v709_v27 = vld [vmem:[%s954_s5 + $0x30] sm:$0xff]   ;;  %vm457_vm6 = vcmp.lt.s32.totalorder %v456_v6, 3 }
  0x18   :  { %v710_v28 = vld [vmem:[%s954_s5 + $0x38] sm:$0xff]   ;;  %v711_v29 = vld [vmem:[%s956_s7] sm:$0xff]   ;;  %v712_v30 = vld [vmem:[%s956_s7 + $0x8] sm:$0xff]  }
  0x19   :  { %629 = vmatpush3.bf16.msra.mxu0 %v75_v5  ;;  %637 = vmatpush3.bf16.msra.mxu1 %v700_v7  ;;  %v713_v31 = vld [vmem:[%s956_s7 + $0x10] sm:$0xff]   ;;  %v714_v32 = vld [vmem:[%s956_s7 + $0x18] sm:$0xff]   ;;  %v715_v33 = vld [vmem:[%s956_s7 + $0x20] sm:$0xff]   ;;  %v760_v7 = vmov 1.0  }
  0x1a   :  { %646 = vmatprep.subr.bf16.mxu0 %v758_v0  ;;  %638 = vmatprep.subr.bf16.mxu1 %v758_v0  ;;  %v716_v34 = vld [vmem:[%s956_s7 + $0x28] sm:$0xff]   ;;  %v569_v35 = vld [vmem:[%s953_s4] ss:$0 sm:$0xff]  ;;  %v717_v45 = vld [vmem:[%s956_s7 + $0x30] sm:$0xff]  }
  0x1b   :  { %v718_v46 = vld [vmem:[%s956_s7 + $0x38] sm:$0xff]   ;;  %v575_v47 = vld [vmem:[%s955_s6] ss:$0 sm:$0xff] }
  0x1c   :  { %631 = vmatmul.mubr.msk.bf16.vlgmr.msra.gmra.mrb[0].mxu0 %vm69_vm2, %v49_v8  ;;  %v584_v59 = vld [vmem:[%s957_s8] ss:$0 sm:$0xff] }
  0x1d   :  { %662 = vmatprep.mubr.msk.bf16.mxu0 %vm759_vm0, %v758_v0  ;;  %639 = vmatpush3.bf16.msra.mxu1 %v701_v9 }
  0x1e   :  { %640 = vmatprep.subr.bf16.mxu1 %v758_v0  ;;  %647 = vmatpush3.bf16.msra.mxu0 %v703_v11 }
  0x1f   :  { %648 = vmatprep.subr.bf16.mxu0 %v758_v0 }
  0x21   :  { %641 = vmatpush3.bf16.msra.mxu1 %v702_v10 }
  0x22   :  { %666 = vmatprep.subr.bf16.mxu1 %v758_v0  ;;  %649 = vmatpush3.bf16.msra.mxu0 %v704_v12 }
  0x23   :  { %650 = vmatprep.subr.bf16.mxu0 %v758_v0 }
  0x26   :  { %651 = vmatpush3.bf16.msra.mxu0 %v705_v13 }
  0x27   :  { %652 = vmatprep.subr.bf16.mxu0 %v758_v0 }
  0x2a   :  { %653 = vmatpush3.bf16.msra.mxu0 %v706_v14 }
  0x2b   :  { %654 = vmatprep.subr.bf16.mxu0 %v758_v0 }
  0x2e   :  { %655 = vmatpush3.bf16.msra.mxu0 %v707_v15 }
  0x2f   :  { %656 = vmatprep.subr.bf16.mxu0 %v758_v0 }
  0x32   :  { %657 = vmatpush3.bf16.msra.mxu0 %v708_v16 }
  0x33   :  { %658 = vmatprep.subr.bf16.mxu0 %v758_v0 }
  0x36   :  { %659 = vmatpush3.bf16.msra.mxu0 %v709_v27 }
  0x37   :  { %660 = vmatprep.subr.bf16.mxu0 %v758_v0 }
  0x3a   :  { %661 = vmatpush3.bf16.msra.mxu0 %v710_v28 }
  0x3b   :  { %686 = vmatprep.subr.msk.mxu0 %vm457_vm6, %v760_v7 }
  0xef   :  { %v111_v18 = vpop.f32.mrb[0].mxu0 }
  0xf0   :  { %v112_v19 = vadd.f32 %v565_v17, %v111_v18  ;;  %v632_v20 = vpop.f32.mrb[1].mxu0 }
  0xf1   :  { %v114_v21 = vpop.f32.mrb[2].mxu0 }
  0xf2   :  { %v115_v22 = vadd.f32 %v565_v17, %v114_v21  ;;  %v633_v23 = vpop.f32.mrb[3].mxu0  ;;  %v118_v24 = vmax.f32 %v112_v19, 0.0 }
  0xf4   :  { %v119_v25 = vmax.f32 %v115_v22, 0.0 }
  0xf6   :  { %v120_v26 = vpack.c.bf16 %v119_v25, %v118_v24 }
  0xf8   :  { %643 = vmatmul.mubr.msk.bf16.vlgmr.msra.gmra.mrb[0].mxu1 %vm160_vm3, %v120_v26 }
  0xf9   :  { %682 = vmatprep.mubr.msk.bf16.mxu1 %vm759_vm0, %v758_v0  ;;  %667 = vmatpush3.bf16.msra.mxu1 %v711_v29 }
  0xfa   :  { %668 = vmatprep.subr.bf16.mxu1 %v758_v0 }
  0xfd   :  { %669 = vmatpush3.bf16.msra.mxu1 %v712_v30 }
  0xfe   :  { %670 = vmatprep.subr.bf16.mxu1 %v758_v0 }
 0x101   :  { %671 = vmatpush3.bf16.msra.mxu1 %v713_v31 }
 0x102   :  { %672 = vmatprep.subr.bf16.mxu1 %v758_v0 }
 0x105   :  { %673 = vmatpush3.bf16.msra.mxu1 %v714_v32 }
 0x106   :  { %674 = vmatprep.subr.bf16.mxu1 %v758_v0 }
 0x109   :  { %675 = vmatpush3.bf16.msra.mxu1 %v715_v33 }
 0x10a   :  { %676 = vmatprep.subr.bf16.mxu1 %v758_v0 }
 0x10d   :  { %677 = vmatpush3.bf16.msra.mxu1 %v716_v34 }
 0x10e   :  { %678 = vmatprep.subr.bf16.mxu1 %v758_v0 }
 0x111   :  { %679 = vmatpush3.bf16.msra.mxu1 %v717_v45 }
 0x112   :  { %680 = vmatprep.subr.bf16.mxu1 %v758_v0 }
 0x115   :  { %681 = vmatpush3.bf16.msra.mxu1 %v718_v46 }
 0x1cb   :  { %v198_v36 = vpop.f32.mrb[0].mxu1 }
 0x1cc   :  { %v199_v37 = vadd.f32 %v569_v35, %v198_v36  ;;  %v644_v38 = vpop.f32.mrb[1].mxu1 }
 0x1cd   :  { %v201_v39 = vpop.f32.mrb[2].mxu1 }
 0x1ce   :  { %v202_v40 = vadd.f32 %v569_v35, %v201_v39  ;;  %v645_v41 = vpop.f32.mrb[3].mxu1  ;;  %v205_v42 = vmax.f32 %v199_v37, 0.0 }
 0x1d0   :  { %v206_v43 = vmax.f32 %v202_v40, 0.0 }
 0x1d2   :  { %v207_v44 = vpack.c.bf16 %v206_v43, %v205_v42 }
 0x1d4   :  { %663 = vmatmul.mubr.bf16.vlgmr.msra.gmra.mrb[4].mxu0 %v207_v44 }
 0x1d5   :  { %687 = vmatpush3.msk.msra.mxu0 %vm457_vm6, %v760_v7 }
 0x2a7   :  { %v313_v48 = vpop.f32.mrb[4].mxu0 }
 0x2a8   :  { %v314_v49 = vadd.f32 %v575_v47, %v313_v48  ;;  %v664_v50 = vpop.f32.mrb[5].mxu0 }
 0x2a9   :  { %v316_v51 = vpop.f32.mrb[6].mxu0 }
 0x2aa   :  { %v317_v52 = vadd.f32 %v575_v47, %v316_v51  ;;  %v665_v53 = vpop.f32.mrb[7].mxu0  ;;  %v320_v54 = vmax.f32 %v314_v49, 0.0 }
 0x2ac   :  { %v321_v55 = vmax.f32 %v317_v52, 0.0 }
 0x2ae   :  { %v322_v56 = vpack.c.bf16 %v321_v55, %v320_v54 }
 0x2b0   :  { %683 = vmatmul.mubr.bf16.vlgmr.msra.gmra.mrb[4].mxu1 %v322_v56 }
 0x383   :  { %v428_v60 = vpop.f32.mrb[4].mxu1 }
 0x384   :  { %v429_v61 = vadd.f32 %v584_v59, %v428_v60  ;;  %v684_v62 = vpop.f32.mrb[5].mxu1 }
 0x385   :  { %v431_v63 = vpop.f32.mrb[6].mxu1 }
 0x386   :  { %v432_v0 = vadd.f32 %v584_v59, %v431_v63  ;;  %v685_v1 = vpop.f32.mrb[7].mxu1  ;;  %v438_v2 = vsel %vm437_vm4, %v429_v61, -inf  ;;  %v545_v19 = vmul.f32 0.5, %v429_v61 }
 0x387   :  { %v441_v3 = vsel %vm440_vm5, %v438_v2, -inf }
 0x388   :  { %442 = vmax.xlane.f32.xlu0 %v441_v3  ;;  %v439_v4 = vsel %vm437_vm4, %v432_v0, -inf  ;;  %v546_v18 = vmul.f32 0.5, %v432_v0 }
 0x389   :  { %v444_v5 = vsel %vm440_vm5, %v439_v4, -inf }
 0x38c   :  { %445 = vmax.xlane.f32.xlu0 %v444_v5 }
 0x415   :  { %v443_v8 = vpop.xlane.xlu0 %442 }
 0x416   :  { %v447_v9 = vsub.f32 %v429_v61, %v443_v8 }
 0x418   :  { %v449_v10 = vmul.f32 1.442695, %v447_v9 }
 0x419   :  { %v446_v11 = vpop.xlane.xlu0 %445 }
 0x41a   :  { %719 = vpow2.f32 %v449_v10  ;;  %v448_v12 = vsub.f32 %v432_v0, %v446_v11 }
 0x41c   :  { %v451_v13 = vmul.f32 1.442695, %v448_v12 }
 0x41e   :  { %721 = vpow2.f32 %v451_v13 }
 0x41f   :  { %723 = vtanh.f32 %v546_v18 }
 0x420   :  { %725 = vtanh.f32 %v545_v19 }
 0x424   :  { %v720_v14 = vpop.eup %719 }
 0x425   :  { %v453_v15 = vsel %vm437_vm4, %v720_v14, 0.0 }
 0x426   :  { %688 = vmatprep.mubr.msk.f32.mxu0 %vm440_vm5, %v453_v15 }
 0x428   :  { %v722_v16 = vpop.eup %721 }
 0x429   :  { %v454_v17 = vsel %vm437_vm4, %v722_v16, 0.0  ;;  %v724_v22 = vpop.eup %723 }
 0x42a   :  { %689 = vmatmul.mubr.msk.f32.vlgmr.msra.gmra.mrb[8].mxu0 %vm440_vm5, %v454_v17  ;;  %v726_v23 = vpop.eup %725  ;;  %v550_v24 = vadd.f32 1.0, %v724_v22 }
 0x42b   :  { %v549_v25 = vadd.f32 1.0, %v726_v23 }
 0x42c   :  { %v552_v26 = vmul.f32 0.5, %v550_v24 }
 0x42d   :  { %v551_v27 = vmul.f32 0.5, %v549_v25 }
 0x42e   :  { %v555_v31 = vsel %vm553_vm7, %v432_v0, %v552_v26 }
 0x42f   :  { %v554_v33 = vsel %vm553_vm7, %v429_v61, %v551_v27 }
 0x4fd   :  { %v690_v20 = vpop.f32.mrb[8].mxu0 }
 0x4fe   :  { %727 = vrcp.f32 %v690_v20  ;;  %v532_v21 = vpop.f32.mrb[9].mxu0 }
 0x4ff   :  { %729 = vrcp.f32 %v532_v21 }
 0x508   :  { %v728_v28 = vpop.eup %727 }
 0x509   :  { %v730_v29 = vpop.eup %729  ;;  %v544_v30 = vmul.f32 %v728_v28, %v454_v17 }
 0x50a   :  { %v543_v32 = vmul.f32 %v730_v29, %v453_v15 }
 0x50b   :  { %v557_v34 = vsel %vm437_vm4, %v544_v30, %v555_v31 }
 0x50c   :  { %559 = vst.msk [vmem:[%s958_s9 + $0x8] sm:$0xff] %vm440_vm5, %v557_v34  ;;  %v556_v35 = vsel %vm437_vm4, %v543_v32, %v554_v33 }
 0x50d   :  { %558 = vst.msk [vmem:[%s958_s9] sm:$0xff] %vm440_vm5, %v556_v35 }
 0x50e   :  { %564 = vsyncpa [#allocation3], 1 }

</bundles_post_ra>
